<compile_context>
chip_gen: v5e
topology: v5e:2x2
jax: 0.10.0
libtpu: 0.0.40
codegen_flags: <defaults>
</compile_context>

<pallas_src>
import functools

import jax
import jax.numpy as jnp
from jax.experimental import pallas as pl
from jax.experimental.pallas import tpu as pltpu


def _round_up(x, m):
    return ((x + m - 1) // m) * m


@functools.lru_cache(maxsize=1)
def _chip_info():
    """(vmem_capacity_bytes, tensorcores_per_chip) with safe fallbacks."""
    vmem_cap = 64 << 20  # conservative fallback, valid on every generation
    try:
        vmem_cap = int(pltpu.get_tpu_info().vmem_capacity_bytes)
    except Exception:
        pass
    n_cores = 1
    try:
        kind = jax.devices()[0].device_kind.lower()
        if "v7" in kind:
            n_cores = 2
    except Exception:
        pass
    return vmem_cap, n_cores


def _residual_block_kernel(x_ref, w1t_ref, w2t_ref, o_ref):
    # x_ref:   (tm, C)  tile of input rows
    # w1t_ref: (C, C)   W1 transposed (in, out), resident across the grid
    # w2t_ref: (C, C)   W2 transposed (in, out), resident across the grid
    x = x_ref[...]
    w1t = w1t_ref[...]
    w2t = w2t_ref[...]

    # GEMM #1: feed both operands at the weight dtype so bf16 weights take the
    # native bf16 MXU path (cheap VPU cast, hidden under MXU/DMA slack).
    # f32 accumulation on the MXU either way.
    xm = x.astype(w1t.dtype)
    h = jnp.dot(xm, w1t, preferred_element_type=jnp.float32)
    h = jnp.maximum(h, 0.0)

    # GEMM #2: same treatment for the activation operand.
    h = h.astype(w2t.dtype)
    t = jnp.dot(h, w2t, preferred_element_type=jnp.float32)
    t = jnp.maximum(t, 0.0)

    # Residual add in f32 (VPU, free under MXU slack), cast to output dtype.
    o_ref[...] = (x.astype(jnp.float32) + t).astype(o_ref.dtype)


def prepare_weights(w1, w2, dtype=None):
    """One-time prep: transpose PyTorch (out,in) weights to (in,out) and
    optionally cast. dtype=jnp.bfloat16 is the recommended setting for the
    GEMM operands (native MXU rate on all generations; biggest win on v5e).
    Do this at parameter-load time, NOT per forward call."""
    w1t, w2t = w1.T, w2.T
    if dtype is not None:
        w1t, w2t = w1t.astype(dtype), w2t.astype(dtype)
    return w1t, w2t


@functools.partial(jax.jit, static_argnames=("tm",))
def residual_block(x, w1t, w2t, *, tm=1024):
    """x: (N, C); w1t, w2t: (C, C) pre-transposed (in, out) weights.

    For best HBM efficiency on v7x/v6e pass x (and therefore get the output)
    in bf16 together with bf16 weights — ReLU/residual are still done in f32.
    """
    N, C = x.shape
    assert w1t.shape == (C, C) and w2t.shape == (C, C)

    vmem_cap, n_cores = _chip_info()

    # Effective row tile: multiple of 8 (f32 sublanes), no larger than the
    # request or than N itself. Only on multi-TensorCore chips (v7x) do we
    # additionally cap so the grid has >= 2 steps per core (pipeline overlap
    # per core), and never fragment below 128 rows for that purpose.
    tm_req = _round_up(tm, 8)
    tm_eff = max(8, min(tm_req, _round_up(N, 8)))
    if n_cores >= 2:
        per_core_cap = max(128, _round_up(pl.cdiv(N, 2 * n_cores), 8))
        tm_eff = max(8, min(tm_eff, per_core_cap))

    # Pad rows to a multiple of the tile (tail handled by one extra grid step
    # on zero rows; residual-of-zeros is zero and is sliced off below).
    Np = _round_up(N, tm_eff)
    x_in = x if Np == N else jnp.pad(x, ((0, Np - N), (0, 0)))
    grid = (Np // tm_eff,)

    # VMEM budget: weights single-buffered (Buffered(1), grid-invariant),
    # x/out tiles double-buffered, f32 intermediates, plus headroom; capped
    # at ~80% of this chip's physical VMEM.
    w_bytes = 2 * C * C * jnp.dtype(w1t.dtype).itemsize
    io_bytes = 2 * 2 * tm_eff * C * jnp.dtype(x.dtype).itemsize
    acc_bytes = 2 * tm_eff * C * 4
    est_bytes = w_bytes + io_bytes + acc_bytes
    vmem_limit = int(est_bytes * 1.25) + (4 << 20)
    vmem_limit = max(vmem_limit, 32 << 20)
    vmem_limit = min(vmem_limit, int(0.8 * vmem_cap))

    cost = pl.CostEstimate(
        flops=4 * Np * C * C,  # two Np x C x C matmuls, 2 flops per MAC
        transcendentals=0,
        bytes_accessed=2 * Np * C * jnp.dtype(x.dtype).itemsize
        + 2 * C * C * jnp.dtype(w1t.dtype).itemsize,
    )

    out = pl.pallas_call(
        _residual_block_kernel,
        out_shape=jax.ShapeDtypeStruct((Np, C), x.dtype),
        grid_spec=pl.GridSpec(
            grid=grid,
            in_specs=[
                # x row tile (double-buffered by the pipeline).
                pl.BlockSpec((tm_eff, C), lambda i: (i, 0)),
                # Resident weights: constant index_map -> single buffer.
                pl.BlockSpec((C, C), lambda i: (0, 0),
                             pipeline_mode=pl.Buffered(1)),
                pl.BlockSpec((C, C), lambda i: (0, 0),
                             pipeline_mode=pl.Buffered(1)),
            ],
            out_specs=pl.BlockSpec((tm_eff, C), lambda i: (i, 0)),
        ),
        compiler_params=pltpu.CompilerParams(
            dimension_semantics=("parallel",),
            vmem_limit_bytes=vmem_limit,
        ),
        cost_estimate=cost,
    )(x_in, w1t, w2t)

    return out if Np == N else out[:N]


def residual_block_ref(x, w1, w2):
    """Pure-JAX reference matching the PyTorch forward (torch-layout weights)."""
    h = jnp.maximum(x @ w1.T, 0.0)
    t = jnp.maximum(h @ w2.T, 0.0)
    return x + t


if __name__ == "__main__":
    # Small shapes consistent with the module (nChn parameterizes both Linears).
    N, nChn = 64, 256

    key = jax.random.PRNGKey(0)
    kx, k1, k2 = jax.random.split(key, 3)

    x = jax.random.normal(kx, (N, nChn), dtype=jnp.float32)
    # Deterministic synthetic weights, PyTorch (out_features, in_features) layout.
    w1 = jax.random.normal(k1, (nChn, nChn), dtype=jnp.float32) * 0.05
    w2 = jax.random.normal(k2, (nChn, nChn), dtype=jnp.float32) * 0.05

    ref = residual_block_ref(x, w1, w2)

    # ---- 1) f32 weight path (strict tolerance) ----
    w1t_f32, w2t_f32 = prepare_weights(w1, w2)
    out = jax.block_until_ready(residual_block(x, w1t_f32, w2t_f32))
    assert out.shape == (N, nChn)
    assert jnp.allclose(out, ref, atol=1e-4, rtol=1e-4), "f32 mismatch vs reference"

    # ---- 2) bf16 weight path (native MXU rate on both GEMMs) ----
    w1t_bf, w2t_bf = prepare_weights(w1, w2, dtype=jnp.bfloat16)
    out_bf = jax.block_until_ready(residual_block(x, w1t_bf, w2t_bf))
    w1_q = w1.astype(jnp.bfloat16).astype(jnp.float32)
    w2_q = w2.astype(jnp.bfloat16).astype(jnp.float32)
    ref_bf = residual_block_ref(x, w1_q, w2_q)
    assert jnp.allclose(out_bf, ref_bf, atol=5e-2, rtol=5e-2), "bf16-weight mismatch"

    # ---- 3) bf16 activations + bf16 weights (halves HBM traffic; v7x/v6e) ----
    x_bf = x.astype(jnp.bfloat16)
    out_bf_io = jax.block_until_ready(residual_block(x_bf, w1t_bf, w2t_bf))
    assert out_bf_io.dtype == jnp.bfloat16
    ref_bf_io = residual_block_ref(x_bf.astype(jnp.float32), w1_q, w2_q)
    assert jnp.allclose(out_bf_io.astype(jnp.float32), ref_bf_io,
                        atol=1e-1, rtol=5e-2), "bf16-activation mismatch"

    # ---- 4) non-tile-multiple N (padded tail path) ----
    x_odd = x[: N - 5]
    out_odd = jax.block_until_ready(residual_block(x_odd, w1t_f32, w2t_f32))
    ref_odd = residual_block_ref(x_odd, w1, w2)
    assert out_odd.shape == (N - 5, nChn)
    assert jnp.allclose(out_odd, ref_odd, atol=1e-4, rtol=1e-4), "tail mismatch"

    # ---- 5) force a multi-step grid at small N (exercises pipelining + Buffered(1)) ----
    out_tiled = jax.block_until_ready(residual_block(x, w1t_f32, w2t_f32, tm=16))
    assert jnp.allclose(out_tiled, ref, atol=1e-4, rtol=1e-4), "tiled-grid mismatch"

    print("KERNEL_OK")
</pallas_src>

<mosaic_0001>
module attributes {stable_mosaic.version = 11 : i64} {
  func.func @_residual_block_kernel(%arg0: i32, %arg1: memref<64x256xf32, #tpu.memory_space<vmem>>, %arg2: memref<256x256xf32, #tpu.memory_space<vmem>>, %arg3: memref<256x256xf32, #tpu.memory_space<vmem>>, %arg4: memref<64x256xf32, #tpu.memory_space<vmem>>) attributes {dimension_semantics = [#tpu.dimension_semantics<parallel>], iteration_bounds = array<i64: 1>, scalar_prefetch = 0 : i64, scratch_operands = 0 : i64, tpu.core_type = #tpu.core_type<tc>, window_params = [{transform_indices = @transform_0, window_bounds = array<i64: 64, 256>}, {pipeline_mode = #tpu.pipeline_mode<synchronous>, transform_indices = @transform_1, window_bounds = array<i64: 256, 256>}, {pipeline_mode = #tpu.pipeline_mode<synchronous>, transform_indices = @transform_2, window_bounds = array<i64: 256, 256>}, {transform_indices = @transform_3, window_bounds = array<i64: 64, 256>}]} {
    %c0 = arith.constant 0 : index
    %c0_0 = arith.constant 0 : index
    %0 = vector.load %arg1[%c0, %c0_0] : memref<64x256xf32, #tpu.memory_space<vmem>>, vector<64x256xf32>
    %c0_1 = arith.constant 0 : index
    %c0_2 = arith.constant 0 : index
    %1 = vector.load %arg2[%c0_1, %c0_2] : memref<256x256xf32, #tpu.memory_space<vmem>>, vector<256x256xf32>
    %c0_3 = arith.constant 0 : index
    %c0_4 = arith.constant 0 : index
    %2 = vector.load %arg3[%c0_3, %c0_4] : memref<256x256xf32, #tpu.memory_space<vmem>>, vector<256x256xf32>
    %cst = arith.constant dense<0.000000e+00> : vector<64x256xf32>
    %3 = tpu.matmul %0, %1, %cst {dimension_numbers = #tpu.dot_dimension_numbers<[1], [0], [0], [1], [0, 0, 1, 1], [], []>} : vector<64x256xf32>, vector<256x256xf32>, vector<64x256xf32> -> vector<64x256xf32>
    %cst_5 = arith.constant 0.000000e+00 : f32
    %4 = vector.broadcast %cst_5 : f32 to vector<64x256xf32>
    %5 = arith.maximumf %3, %4 : vector<64x256xf32>
    %cst_6 = arith.constant dense<0.000000e+00> : vector<64x256xf32>
    %6 = tpu.matmul %5, %2, %cst_6 {dimension_numbers = #tpu.dot_dimension_numbers<[1], [0], [0], [1], [0, 0, 1, 1], [], []>} : vector<64x256xf32>, vector<256x256xf32>, vector<64x256xf32> -> vector<64x256xf32>
    %cst_7 = arith.constant 0.000000e+00 : f32
    %7 = vector.broadcast %cst_7 : f32 to vector<64x256xf32>
    %8 = arith.maximumf %6, %7 : vector<64x256xf32>
    %9 = arith.addf %0, %8 : vector<64x256xf32>
    %c0_8 = arith.constant 0 : index
    %c0_9 = arith.constant 0 : index
    %10 = vector.load %arg4[%c0_8, %c0_9] : memref<64x256xf32, #tpu.memory_space<vmem>>, vector<64x256xf32>
    tpu.vector_store %arg4[%c0_8, %c0_9], %9 {strides = array<i32>} : memref<64x256xf32, #tpu.memory_space<vmem>>, vector<64x256xf32>,
    return
  }
  func.func @transform_0(%arg0: i32) -> (i32, i32) {
    %c0_i32 = arith.constant 0 : i32
    %c0_i32_0 = arith.constant 0 : i32
    return %arg0, %c0_i32 : i32, i32
  }
  func.func @transform_1(%arg0: i32) -> (i32, i32) {
    %c0_i32 = arith.constant 0 : i32
    %c0_i32_0 = arith.constant 0 : i32
    %c0_i32_1 = arith.constant 0 : i32
    return %c0_i32, %c0_i32_0 : i32, i32
  }
  func.func @transform_2(%arg0: i32) -> (i32, i32) {
    %c0_i32 = arith.constant 0 : i32
    %c0_i32_0 = arith.constant 0 : i32
    %c0_i32_1 = arith.constant 0 : i32
    return %c0_i32, %c0_i32_0 : i32, i32
  }
  func.func @transform_3(%arg0: i32) -> (i32, i32) {
    %c0_i32 = arith.constant 0 : i32
    %c0_i32_0 = arith.constant 0 : i32
    return %arg0, %c0_i32 : i32, i32
  }
}

</mosaic_0001>

<bundles_post_ra>
// kernel: residual_block.1
= control target key start
LH: loop header
LB: loop body
LE: loop exit
PB: predicated region body
PF: predicated region fallthrough
CT: control target
= control target key end

     0   :  { %8 = vsyncpa [#allocation3], 0  ;;  %s856_s0 = inlined_call_operand.hbm [shape: f32[64,256], index: 0, kind: input, shape index: {}]   ;;  %s857_s1 = inlined_call_operand.hbm [shape: f32[256,256], index: 1, kind: input, shape index: {}]   ;;  %s858_s2 = inlined_call_operand.hbm [shape: f32[256,256], index: 2, kind: input, shape index: {}]   ;;  %s859_s3 = inlined_call_operand.hbm [shape: f32[64,256], index: 3, kind: output, shape index: {}]  }
   0x1   :  { %9 = vsyncpa [#allocation6], 0 }
   0x2   :  { %10 = vsyncpa [#allocation4], 0  ;;  %s28_s14 = sshll.u32 %s857_s1, 4  ;;  %s726_s15 = smov [#allocation5]   ;;  %s29_s14 = int_to_ptr.hbm [resolvable:$true] %s28_s14 }
   0x3   :  { %s30_s16 = sshll.u32 %s726_s15, 4  ;;  %s15_s19 = sshll.u32 %s856_s0, 4  ;;  %s31_s16 = int_to_ptr.vmem [resolvable:$true] %s30_s16  ;;  %s16_s19 = int_to_ptr.hbm [resolvable:$true] %s15_s19 }
   0x4   :  { %s727_s20 = smov 256   ;;  %s728_s21 = smov 16  }
   0x5   :  { %36 = dma.hbm_to_vmem [thread:$0]  %s29_s14, 8192, %s31_s16, [#allocation6], %s727_s20, %s727_s20, %s728_s21  }
   0x6   :  { %s729_s22 = smov [#allocation2]   ;;  %s41_s1 = sshll.u32 %s858_s2, 4  ;;  %s42_s1 = int_to_ptr.hbm [resolvable:$true] %s41_s1 }
   0x7   :  { %s17_s23 = sshll.u32 %s729_s22, 4  ;;  %s730_s0 = smov [#allocation7]   ;;  %s18_s23 = int_to_ptr.vmem [resolvable:$true] %s17_s23 }
   0x8   :  { %23 = dma.hbm_to_vmem [thread:$0]  %s16_s19, 2048, %s18_s23, [#allocation3], %s727_s20, %s727_s20, %s728_s21  }
   0x9   :  { %s43_s26 = sshll.u32 %s730_s0, 4  ;;  %s44_s26 = int_to_ptr.vmem [resolvable:$true] %s43_s26 }
   0xa   :  { %49 = dma.hbm_to_vmem [thread:$0]  %s42_s1, 8192, %s44_s26, [#allocation6], %s727_s20, %s727_s20, %s728_s21  }
   0xb   :  { %720 = dma.done.wait [#allocation3], 2048  }
   0xc   :  { %721 = vsyncadd [#allocation3], 4294965248 }
   0xd   :  { %722 = dma.done.wait [#allocation6], 16384  }
   0xe   :  { %723 = vsyncadd [#allocation6], 4294950912  ;;  %v109_v0 = vld [vmem:[#allocation5 + $0xf8] sm:$0xff]  ;;  %v107_v2 = vld [vmem:[#allocation5 + $0xe8] sm:$0xff]  ;;  %s731_s2 = smov [#allocation8]   ;;  %s604_s30 = sshll.u32 %s859_s3, 4  ;;  %s605_s30 = int_to_ptr.hbm [resolvable:$true] %s604_s30 }
   0xf   :  { %v141_v1 = vld [vmem:[#allocation5 + $0x1f8] sm:$0xff]  ;;  %288 = vmatpush.msra.mxu2 %v109_v0  ;;  %v139_v3 = vld [vmem:[#allocation5 + $0x1e8] sm:$0xff]  ;;  %v108_v6 = vld [vmem:[#allocation5 + $0xf0] sm:$0xff]  ;;  %s602_s27 = sshll.u32 %s731_s2, 4  ;;  %s603_s27 = int_to_ptr.vmem [resolvable:$true] %s602_s27 }
  0x10   :  { %329 = vmatpush.msra.mxu3 %v141_v1  ;;  %v105_v4 = vld [vmem:[#allocation5 + $0xd8] sm:$0xff]  ;;  %v140_v7 = vld [vmem:[#allocation5 + $0x1f0] sm:$0xff]  ;;  %v106_v8 = vld [vmem:[#allocation5 + $0xe0] sm:$0xff]  ;;  %206 = vmatpush.msra.mxu0 %v108_v6 }
  0x11   :  { %v137_v5 = vld [vmem:[#allocation5 + $0x1d8] sm:$0xff]  ;;  %289 = vmatpush.msra.mxu2 %v107_v2  ;;  %v138_v9 = vld [vmem:[#allocation5 + $0x1e0] sm:$0xff]  ;;  %247 = vmatpush.msra.mxu1 %v140_v7  ;;  %v103_v10 = vld [vmem:[#allocation5 + $0xc8] sm:$0xff] }
  0x12   :  { %330 = vmatpush.msra.mxu3 %v139_v3  ;;  %v135_v11 = vld [vmem:[#allocation5 + $0x1c8] sm:$0xff]  ;;  %v104_v12 = vld [vmem:[#allocation5 + $0xd0] sm:$0xff]  ;;  %207 = vmatpush.msra.mxu0 %v106_v8  ;;  %v101_v14 = vld [vmem:[#allocation5 + $0xb8] sm:$0xff] }
  0x13   :  { %290 = vmatpush.msra.mxu2 %v105_v4  ;;  %v136_v13 = vld [vmem:[#allocation5 + $0x1d0] sm:$0xff]  ;;  %248 = vmatpush.msra.mxu1 %v138_v9  ;;  %v133_v15 = vld [vmem:[#allocation5 + $0x1b8] sm:$0xff]  ;;  %v102_v16 = vld [vmem:[#allocation5 + $0xc0] sm:$0xff] }
  0x14   :  { %331 = vmatpush.msra.mxu3 %v137_v5  ;;  %v134_v17 = vld [vmem:[#allocation5 + $0x1c0] sm:$0xff]  ;;  %208 = vmatpush.msra.mxu0 %v104_v12  ;;  %v99_v18 = vld [vmem:[#allocation5 + $0xa8] sm:$0xff]  ;;  %v100_v20 = vld [vmem:[#allocation5 + $0xb0] sm:$0xff] }
  0x15   :  { %291 = vmatpush.msra.mxu2 %v103_v10  ;;  %249 = vmatpush.msra.mxu1 %v136_v13  ;;  %v131_v19 = vld [vmem:[#allocation5 + $0x1a8] sm:$0xff]  ;;  %v132_v21 = vld [vmem:[#allocation5 + $0x1b0] sm:$0xff]  ;;  %v97_v22 = vld [vmem:[#allocation5 + $0x98] sm:$0xff] }
  0x16   :  { %332 = vmatpush.msra.mxu3 %v135_v11  ;;  %209 = vmatpush.msra.mxu0 %v102_v16  ;;  %v129_v23 = vld [vmem:[#allocation5 + $0x198] sm:$0xff]  ;;  %v98_v24 = vld [vmem:[#allocation5 + $0xa0] sm:$0xff]  ;;  %v95_v26 = vld [vmem:[#allocation5 + $0x88] sm:$0xff] }
  0x17   :  { %292 = vmatpush.msra.mxu2 %v101_v14  ;;  %250 = vmatpush.msra.mxu1 %v134_v17  ;;  %v130_v25 = vld [vmem:[#allocation5 + $0x1a0] sm:$0xff]  ;;  %v127_v27 = vld [vmem:[#allocation5 + $0x188] sm:$0xff]  ;;  %v96_v28 = vld [vmem:[#allocation5 + $0x90] sm:$0xff] }
  0x18   :  { %333 = vmatpush.msra.mxu3 %v133_v15  ;;  %210 = vmatpush.msra.mxu0 %v100_v20  ;;  %v128_v29 = vld [vmem:[#allocation5 + $0x190] sm:$0xff]  ;;  %v93_v30 = vld [vmem:[#allocation5 + $0x78] sm:$0xff]  ;;  %v94_v32 = vld [vmem:[#allocation5 + $0x80] sm:$0xff] }
  0x19   :  { %293 = vmatpush.msra.mxu2 %v99_v18  ;;  %251 = vmatpush.msra.mxu1 %v132_v21  ;;  %v125_v31 = vld [vmem:[#allocation5 + $0x178] sm:$0xff]  ;;  %v126_v33 = vld [vmem:[#allocation5 + $0x180] sm:$0xff]  ;;  %v91_v34 = vld [vmem:[#allocation5 + $0x68] sm:$0xff] }
  0x1a   :  { %334 = vmatpush.msra.mxu3 %v131_v19  ;;  %211 = vmatpush.msra.mxu0 %v98_v24  ;;  %v123_v35 = vld [vmem:[#allocation5 + $0x168] sm:$0xff]  ;;  %v92_v36 = vld [vmem:[#allocation5 + $0x70] sm:$0xff]  ;;  %v89_v38 = vld [vmem:[#allocation5 + $0x58] sm:$0xff] }
  0x1b   :  { %294 = vmatpush.msra.mxu2 %v97_v22  ;;  %252 = vmatpush.msra.mxu1 %v130_v25  ;;  %v124_v37 = vld [vmem:[#allocation5 + $0x170] sm:$0xff]  ;;  %v121_v39 = vld [vmem:[#allocation5 + $0x158] sm:$0xff]  ;;  %v90_v40 = vld [vmem:[#allocation5 + $0x60] sm:$0xff] }
  0x1c   :  { %335 = vmatpush.msra.mxu3 %v129_v23  ;;  %212 = vmatpush.msra.mxu0 %v96_v28  ;;  %v122_v41 = vld [vmem:[#allocation5 + $0x160] sm:$0xff]  ;;  %v87_v42 = vld [vmem:[#allocation5 + $0x48] sm:$0xff]  ;;  %v88_v44 = vld [vmem:[#allocation5 + $0x50] sm:$0xff] }
  0x1d   :  { %295 = vmatpush.msra.mxu2 %v95_v26  ;;  %253 = vmatpush.msra.mxu1 %v128_v29  ;;  %v119_v43 = vld [vmem:[#allocation5 + $0x148] sm:$0xff]  ;;  %v120_v45 = vld [vmem:[#allocation5 + $0x150] sm:$0xff]  ;;  %v85_v46 = vld [vmem:[#allocation5 + $0x38] sm:$0xff] }
  0x1e   :  { %336 = vmatpush.msra.mxu3 %v127_v27  ;;  %213 = vmatpush.msra.mxu0 %v94_v32  ;;  %v117_v47 = vld [vmem:[#allocation5 + $0x138] sm:$0xff]  ;;  %v86_v48 = vld [vmem:[#allocation5 + $0x40] sm:$0xff]  ;;  %v83_v50 = vld [vmem:[#allocation5 + $0x28] sm:$0xff] }
  0x1f   :  { %296 = vmatpush.msra.mxu2 %v93_v30  ;;  %254 = vmatpush.msra.mxu1 %v126_v33  ;;  %v118_v49 = vld [vmem:[#allocation5 + $0x140] sm:$0xff]  ;;  %v115_v51 = vld [vmem:[#allocation5 + $0x128] sm:$0xff]  ;;  %v84_v52 = vld [vmem:[#allocation5 + $0x30] sm:$0xff] }
  0x20   :  { %337 = vmatpush.msra.mxu3 %v125_v31  ;;  %214 = vmatpush.msra.mxu0 %v92_v36  ;;  %v116_v53 = vld [vmem:[#allocation5 + $0x130] sm:$0xff]  ;;  %v81_v54 = vld [vmem:[#allocation5 + $0x18] sm:$0xff]  ;;  %v82_v56 = vld [vmem:[#allocation5 + $0x20] sm:$0xff] }
  0x21   :  { %297 = vmatpush.msra.mxu2 %v91_v34  ;;  %255 = vmatpush.msra.mxu1 %v124_v37  ;;  %v113_v55 = vld [vmem:[#allocation5 + $0x118] sm:$0xff]  ;;  %v114_v57 = vld [vmem:[#allocation5 + $0x120] sm:$0xff]  ;;  %v79_v58 = vld [vmem:[#allocation5 + $0x8] sm:$0xff] }
  0x22   :  { %338 = vmatpush.msra.mxu3 %v123_v35  ;;  %215 = vmatpush.msra.mxu0 %v90_v40  ;;  %v111_v59 = vld [vmem:[#allocation5 + $0x108] sm:$0xff]  ;;  %v770_v60 = vld [vmem:[#allocation2] sm:$0xff]  ;;  %v80_v62 = vld [vmem:[#allocation5 + $0x10] sm:$0xff] }
  0x23   :  { %298 = vmatpush.msra.mxu2 %v89_v38  ;;  %256 = vmatpush.msra.mxu1 %v122_v41  ;;  %v772_v61 = vld [vmem:[#allocation2 + $0x8] sm:$0xff]  ;;  %v112_v63 = vld [vmem:[#allocation5 + $0x110] sm:$0xff]  ;;  %v78_v0 = vld [vmem:[#allocation5] sm:$0xff] }
  0x24   :  { %339 = vmatpush.msra.mxu3 %v121_v39  ;;  %216 = vmatpush.msra.mxu0 %v88_v44  ;;  %v110_v1 = vld [vmem:[#allocation5 + $0x100] sm:$0xff]  ;;  %v778_v2 = vld [vmem:[#allocation2 + $0x10] sm:$0xff]  ;;  %v780_v3 = vld [vmem:[#allocation2 + $0x18] sm:$0xff] }
  0x25   :  { %299 = vmatpush.msra.mxu2 %v87_v42  ;;  %257 = vmatpush.msra.mxu1 %v120_v45  ;;  %v786_v4 = vld [vmem:[#allocation2 + $0x20] sm:$0xff]  ;;  %v788_v5 = vld [vmem:[#allocation2 + $0x28] sm:$0xff]  ;;  %v794_v6 = vld [vmem:[#allocation2 + $0x30] sm:$0xff] }
  0x26   :  { %340 = vmatpush.msra.mxu3 %v119_v43  ;;  %217 = vmatpush.msra.mxu0 %v86_v48  ;;  %v796_v7 = vld [vmem:[#allocation2 + $0x38] sm:$0xff]  ;;  %v800_v8 = vld [vmem:[#allocation2 + $0x40] sm:$0xff]  ;;  %v802_v9 = vld [vmem:[#allocation2 + $0x48] sm:$0xff] }
  0x27   :  { %300 = vmatpush.msra.mxu2 %v85_v46  ;;  %258 = vmatpush.msra.mxu1 %v118_v49  ;;  %v173_v10 = vld [vmem:[#allocation7 + $0xf8] sm:$0xff]  ;;  %v171_v12 = vld [vmem:[#allocation7 + $0xe8] sm:$0xff]  ;;  %v172_v14 = vld [vmem:[#allocation7 + $0xf0] sm:$0xff] }
  0x28   :  { %341 = vmatpush.msra.mxu3 %v117_v47  ;;  %218 = vmatpush.msra.mxu0 %v84_v52  ;;  %v205_v11 = vld [vmem:[#allocation7 + $0x1f8] sm:$0xff]  ;;  %v203_v13 = vld [vmem:[#allocation7 + $0x1e8] sm:$0xff]  ;;  %v204_v15 = vld [vmem:[#allocation7 + $0x1f0] sm:$0xff] }
  0x29   :  { %301 = vmatpush.msra.mxu2 %v83_v50  ;;  %259 = vmatpush.msra.mxu1 %v116_v53  ;;  %v169_v16 = vld [vmem:[#allocation7 + $0xd8] sm:$0xff]  ;;  %v170_v18 = vld [vmem:[#allocation7 + $0xe0] sm:$0xff]  ;;  %v167_v20 = vld [vmem:[#allocation7 + $0xc8] sm:$0xff] }
  0x2a   :  { %342 = vmatpush.msra.mxu3 %v115_v51  ;;  %219 = vmatpush.msra.mxu0 %v82_v56  ;;  %v201_v17 = vld [vmem:[#allocation7 + $0x1d8] sm:$0xff]  ;;  %v202_v19 = vld [vmem:[#allocation7 + $0x1e0] sm:$0xff]  ;;  %v199_v21 = vld [vmem:[#allocation7 + $0x1c8] sm:$0xff] }
  0x2b   :  { %302 = vmatpush.msra.mxu2 %v81_v54  ;;  %260 = vmatpush.msra.mxu1 %v114_v57  ;;  %v168_v22 = vld [vmem:[#allocation7 + $0xd0] sm:$0xff]  ;;  %v165_v24 = vld [vmem:[#allocation7 + $0xb8] sm:$0xff]  ;;  %v166_v26 = vld [vmem:[#allocation7 + $0xc0] sm:$0xff] }
  0x2c   :  { %343 = vmatpush.msra.mxu3 %v113_v55  ;;  %220 = vmatpush.msra.mxu0 %v80_v62  ;;  %v200_v23 = vld [vmem:[#allocation7 + $0x1d0] sm:$0xff]  ;;  %v197_v25 = vld [vmem:[#allocation7 + $0x1b8] sm:$0xff]  ;;  %v198_v27 = vld [vmem:[#allocation7 + $0x1c0] sm:$0xff] }
  0x2d   :  { %303 = vmatpush.msra.mxu2 %v79_v58  ;;  %261 = vmatpush.msra.mxu1 %v112_v63  ;;  %v810_v28 = vld [vmem:[#allocation2 + $0x50] sm:$0xff]  ;;  %v812_v29 = vld [vmem:[#allocation2 + $0x58] sm:$0xff]  ;;  %v163_v30 = vld [vmem:[#allocation7 + $0xa8] sm:$0xff] }
  0x2e   :  { %344 = vmatpush.msra.mxu3 %v111_v59  ;;  %304 = vmatmul.f32.vlgmr.msra.gmra.mxu2 %v770_v60  ;;  %v195_v31 = vld [vmem:[#allocation7 + $0x1a8] sm:$0xff]  ;;  %v164_v32 = vld [vmem:[#allocation7 + $0xb0] sm:$0xff]  ;;  %v161_v34 = vld [vmem:[#allocation7 + $0x98] sm:$0xff] }
  0x2f   :  { %345 = vmatmul.f32.vlgmr.msra.gmra.mxu3 %v772_v61  ;;  %221 = vmatpush.msra.mxu0 %v78_v0  ;;  %v196_v33 = vld [vmem:[#allocation7 + $0x1b0] sm:$0xff]  ;;  %v193_v35 = vld [vmem:[#allocation7 + $0x198] sm:$0xff]  ;;  %v162_v36 = vld [vmem:[#allocation7 + $0xa0] sm:$0xff] }
  0x30   :  { %262 = vmatpush.msra.mxu1 %v110_v1  ;;  %222 = vmatmul.f32.vlgmr.msra.gmra.mxu0 %v770_v60  ;;  %v194_v37 = vld [vmem:[#allocation7 + $0x1a0] sm:$0xff]  ;;  %v159_v38 = vld [vmem:[#allocation7 + $0x88] sm:$0xff]  ;;  %v160_v40 = vld [vmem:[#allocation7 + $0x90] sm:$0xff] }
  0x31   :  { %263 = vmatmul.f32.vlgmr.msra.gmra.mxu1 %v772_v61  ;;  %468 = vmatpush.msrb.mxu2 %v173_v10  ;;  %v191_v39 = vld [vmem:[#allocation7 + $0x188] sm:$0xff]  ;;  %v192_v41 = vld [vmem:[#allocation7 + $0x190] sm:$0xff]  ;;  %v818_v42 = vld [vmem:[#allocation2 + $0x60] sm:$0xff] }
  0x32   :  { %509 = vmatpush.msrb.mxu3 %v205_v11  ;;  %386 = vmatpush.msrb.mxu0 %v172_v14  ;;  %v820_v43 = vld [vmem:[#allocation2 + $0x68] sm:$0xff]  ;;  %v157_v44 = vld [vmem:[#allocation7 + $0x78] sm:$0xff]  ;;  %v158_v46 = vld [vmem:[#allocation7 + $0x80] sm:$0xff] }
  0x33   :  { %427 = vmatpush.msrb.mxu1 %v204_v15  ;;  %469 = vmatpush.msrb.mxu2 %v171_v12  ;;  %v189_v45 = vld [vmem:[#allocation7 + $0x178] sm:$0xff]  ;;  %v190_v47 = vld [vmem:[#allocation7 + $0x180] sm:$0xff]  ;;  %v155_v48 = vld [vmem:[#allocation7 + $0x68] sm:$0xff] }
  0x34   :  { %510 = vmatpush.msrb.mxu3 %v203_v13  ;;  %387 = vmatpush.msrb.mxu0 %v170_v18  ;;  %v187_v49 = vld [vmem:[#allocation7 + $0x168] sm:$0xff]  ;;  %v156_v50 = vld [vmem:[#allocation7 + $0x70] sm:$0xff]  ;;  %v153_v52 = vld [vmem:[#allocation7 + $0x58] sm:$0xff] }
  0x35   :  { %470 = vmatpush.msrb.mxu2 %v169_v16  ;;  %428 = vmatpush.msrb.mxu1 %v202_v19  ;;  %v188_v51 = vld [vmem:[#allocation7 + $0x170] sm:$0xff]  ;;  %v185_v53 = vld [vmem:[#allocation7 + $0x158] sm:$0xff]  ;;  %v154_v54 = vld [vmem:[#allocation7 + $0x60] sm:$0xff] }
  0x36   :  { %307 = vmatmul.f32.gmra.mxu2 %v778_v2  ;;  %511 = vmatpush.msrb.mxu3 %v201_v17  ;;  %v186_v55 = vld [vmem:[#allocation7 + $0x160] sm:$0xff]  ;;  %v826_v56 = vld [vmem:[#allocation2 + $0x70] sm:$0xff]  ;;  %v828_v57 = vld [vmem:[#allocation2 + $0x78] sm:$0xff] }
  0x37   :  { %348 = vmatmul.f32.gmra.mxu3 %v780_v3  ;;  %471 = vmatpush.msrb.mxu2 %v167_v20  ;;  %v151_v58 = vld [vmem:[#allocation7 + $0x48] sm:$0xff]  ;;  %v152_v62 = vld [vmem:[#allocation7 + $0x50] sm:$0xff]  ;;  %v149_v0 = vld [vmem:[#allocation7 + $0x38] sm:$0xff] }
  0x38   :  { %225 = vmatmul.f32.gmra.mxu0 %v778_v2  ;;  %512 = vmatpush.msrb.mxu3 %v199_v21  ;;  %v183_v59 = vld [vmem:[#allocation7 + $0x148] sm:$0xff]  ;;  %v184_v63 = vld [vmem:[#allocation7 + $0x150] sm:$0xff]  ;;  %v181_v1 = vld [vmem:[#allocation7 + $0x138] sm:$0xff] }
  0x39   :  { %266 = vmatmul.f32.gmra.mxu1 %v780_v3  ;;  %388 = vmatpush.msrb.mxu0 %v168_v22  ;;  %v150_v10 = vld [vmem:[#allocation7 + $0x40] sm:$0xff]  ;;  %v147_v12 = vld [vmem:[#allocation7 + $0x28] sm:$0xff]  ;;  %v148_v14 = vld [vmem:[#allocation7 + $0x30] sm:$0xff] }
  0x3a   :  { %429 = vmatpush.msrb.mxu1 %v200_v23  ;;  %472 = vmatpush.msrb.mxu2 %v165_v24  ;;  %v182_v11 = vld [vmem:[#allocation7 + $0x140] sm:$0xff]  ;;  %v179_v13 = vld [vmem:[#allocation7 + $0x128] sm:$0xff]  ;;  %v180_v15 = vld [vmem:[#allocation7 + $0x130] sm:$0xff] }
  0x3b   :  { %513 = vmatpush.msrb.mxu3 %v197_v25  ;;  %389 = vmatpush.msrb.mxu0 %v166_v26  ;;  %v145_v16 = vld [vmem:[#allocation7 + $0x18] sm:$0xff]  ;;  %v146_v18 = vld [vmem:[#allocation7 + $0x20] sm:$0xff]  ;;  %v144_v20 = vld [vmem:[#allocation7 + $0x10] sm:$0xff] }
  0x3c   :  { %430 = vmatpush.msrb.mxu1 %v198_v27  ;;  %473 = vmatpush.msrb.mxu2 %v163_v30  ;;  %v177_v17 = vld [vmem:[#allocation7 + $0x118] sm:$0xff]  ;;  %v178_v19 = vld [vmem:[#allocation7 + $0x120] sm:$0xff]  ;;  %v176_v21 = vld [vmem:[#allocation7 + $0x110] sm:$0xff] }
  0x3d   :  { %514 = vmatpush.msrb.mxu3 %v195_v31  ;;  %390 = vmatpush.msrb.mxu0 %v164_v32  ;;  %v143_v22 = vld [vmem:[#allocation7 + $0x8] sm:$0xff]  ;;  %v142_v24 = vld [vmem:[#allocation7] sm:$0xff] }
  0x3e   :  { %310 = vmatmul.f32.gmra.mxu2 %v786_v4  ;;  %431 = vmatpush.msrb.mxu1 %v196_v33  ;;  %v175_v23 = vld [vmem:[#allocation7 + $0x108] sm:$0xff]  ;;  %v174_v25 = vld [vmem:[#allocation7 + $0x100] sm:$0xff] }
  0x3f   :  { %351 = vmatmul.f32.gmra.mxu3 %v788_v5  ;;  %474 = vmatpush.msrb.mxu2 %v161_v34 }
  0x40   :  { %228 = vmatmul.f32.gmra.mxu0 %v786_v4  ;;  %515 = vmatpush.msrb.mxu3 %v193_v35 }
  0x41   :  { %269 = vmatmul.f32.gmra.mxu1 %v788_v5  ;;  %391 = vmatpush.msrb.mxu0 %v162_v36 }
  0x42   :  { %432 = vmatpush.msrb.mxu1 %v194_v37  ;;  %475 = vmatpush.msrb.mxu2 %v159_v38 }
  0x43   :  { %516 = vmatpush.msrb.mxu3 %v191_v39  ;;  %392 = vmatpush.msrb.mxu0 %v160_v40 }
  0x44   :  { %433 = vmatpush.msrb.mxu1 %v192_v41  ;;  %476 = vmatpush.msrb.mxu2 %v157_v44 }
  0x45   :  { %517 = vmatpush.msrb.mxu3 %v189_v45  ;;  %393 = vmatpush.msrb.mxu0 %v158_v46 }
  0x46   :  { %313 = vmatmul.f32.gmra.mxu2 %v794_v6  ;;  %434 = vmatpush.msrb.mxu1 %v190_v47 }
  0x47   :  { %354 = vmatmul.f32.gmra.mxu3 %v796_v7  ;;  %477 = vmatpush.msrb.mxu2 %v155_v48 }
  0x48   :  { %231 = vmatmul.f32.gmra.mxu0 %v794_v6  ;;  %518 = vmatpush.msrb.mxu3 %v187_v49 }
  0x49   :  { %272 = vmatmul.f32.gmra.mxu1 %v796_v7  ;;  %394 = vmatpush.msrb.mxu0 %v156_v50 }
  0x4a   :  { %435 = vmatpush.msrb.mxu1 %v188_v51  ;;  %478 = vmatpush.msrb.mxu2 %v153_v52 }
  0x4b   :  { %519 = vmatpush.msrb.mxu3 %v185_v53  ;;  %395 = vmatpush.msrb.mxu0 %v154_v54 }
  0x4c   :  { %436 = vmatpush.msrb.mxu1 %v186_v55  ;;  %479 = vmatpush.msrb.mxu2 %v151_v58 }
  0x4d   :  { %520 = vmatpush.msrb.mxu3 %v183_v59  ;;  %396 = vmatpush.msrb.mxu0 %v152_v62 }
  0x4e   :  { %316 = vmatmul.f32.gmra.mxu2 %v800_v8  ;;  %437 = vmatpush.msrb.mxu1 %v184_v63 }
  0x4f   :  { %357 = vmatmul.f32.gmra.mxu3 %v802_v9  ;;  %480 = vmatpush.msrb.mxu2 %v149_v0 }
  0x50   :  { %234 = vmatmul.f32.gmra.mxu0 %v800_v8  ;;  %521 = vmatpush.msrb.mxu3 %v181_v1 }
  0x51   :  { %275 = vmatmul.f32.gmra.mxu1 %v802_v9  ;;  %397 = vmatpush.msrb.mxu0 %v150_v10 }
  0x52   :  { %438 = vmatpush.msrb.mxu1 %v182_v11  ;;  %481 = vmatpush.msrb.mxu2 %v147_v12 }
  0x53   :  { %522 = vmatpush.msrb.mxu3 %v179_v13  ;;  %398 = vmatpush.msrb.mxu0 %v148_v14 }
  0x54   :  { %439 = vmatpush.msrb.mxu1 %v180_v15  ;;  %482 = vmatpush.msrb.mxu2 %v145_v16 }
  0x55   :  { %523 = vmatpush.msrb.mxu3 %v177_v17  ;;  %399 = vmatpush.msrb.mxu0 %v146_v18 }
  0x56   :  { %319 = vmatmul.f32.gmra.mxu2 %v810_v28  ;;  %440 = vmatpush.msrb.mxu1 %v178_v19 }
  0x57   :  { %360 = vmatmul.f32.gmra.mxu3 %v812_v29  ;;  %400 = vmatpush.msrb.mxu0 %v144_v20 }
  0x58   :  { %237 = vmatmul.f32.gmra.mxu0 %v810_v28  ;;  %441 = vmatpush.msrb.mxu1 %v176_v21 }
  0x59   :  { %278 = vmatmul.f32.gmra.mxu1 %v812_v29  ;;  %483 = vmatpush.msrb.mxu2 %v143_v22 }
  0x5a   :  { %524 = vmatpush.msrb.mxu3 %v175_v23  ;;  %401 = vmatpush.msrb.mxu0 %v142_v24 }
  0x5b   :  { %442 = vmatpush.msrb.mxu1 %v174_v25 }
  0x5e   :  { %322 = vmatmul.f32.gmra.mxu2 %v818_v42 }
  0x5f   :  { %363 = vmatmul.f32.gmra.mxu3 %v820_v43 }
  0x60   :  { %240 = vmatmul.f32.gmra.mxu0 %v818_v42 }
  0x61   :  { %281 = vmatmul.f32.gmra.mxu1 %v820_v43 }
  0x66   :  { %325 = vmatmul.f32.gmra.mxu2 %v826_v56 }
  0x67   :  { %366 = vmatmul.f32.gmra.mxu3 %v828_v57 }
  0x68   :  { %243 = vmatmul.f32.gmra.mxu0 %v826_v56 }
  0x69   :  { %284 = vmatmul.f32.gmra.mxu1 %v828_v57 }
  0xad   :  { %v223_v26 = vpop.f32.mrf.mxu0 }
  0xae   :  { %v264_v27 = vpop.f32.mrf.mxu1 }
  0xaf   :  { %v265_v30 = vadd.f32 %v264_v27, %v223_v26 }
  0xb1   :  { %v305_v31 = vpop.f32.mrf.mxu2  ;;  %v370_v33 = vmax.f32 %v265_v30, 0.0 }
  0xb2   :  { %v346_v32 = vpop.f32.mrf.mxu3 }
  0xb3   :  { %v347_v34 = vadd.f32 %v346_v32, %v305_v31  ;;  %402 = vmatmul.f32.vlgmr.msrb.gmra.mxu0 %v370_v33  ;;  %484 = vmatmul.f32.vlgmr.msrb.gmra.mxu2 %v370_v33 }
  0xb5   :  { %v371_v35 = vmax.f32 %v347_v34, 0.0  ;;  %v226_v36 = vpop.f32.mrf.mxu0 }
  0xb6   :  { %v267_v37 = vpop.f32.mrf.mxu1 }
  0xb7   :  { %443 = vmatmul.f32.vlgmr.msrb.gmra.mxu1 %v371_v35  ;;  %525 = vmatmul.f32.vlgmr.msrb.gmra.mxu3 %v371_v35  ;;  %v268_v38 = vadd.f32 %v267_v37, %v226_v36 }
  0xb9   :  { %v308_v39 = vpop.f32.mrf.mxu2  ;;  %v372_v41 = vmax.f32 %v268_v38, 0.0 }
  0xba   :  { %v349_v40 = vpop.f32.mrf.mxu3 }
  0xbb   :  { %v350_v44 = vadd.f32 %v349_v40, %v308_v39  ;;  %405 = vmatmul.f32.gmra.mxu0 %v372_v41  ;;  %487 = vmatmul.f32.gmra.mxu2 %v372_v41 }
  0xbd   :  { %v373_v45 = vmax.f32 %v350_v44, 0.0  ;;  %v229_v46 = vpop.f32.mrf.mxu0 }
  0xbe   :  { %v270_v47 = vpop.f32.mrf.mxu1 }
  0xbf   :  { %446 = vmatmul.f32.gmra.mxu1 %v373_v45  ;;  %528 = vmatmul.f32.gmra.mxu3 %v373_v45  ;;  %v271_v48 = vadd.f32 %v270_v47, %v229_v46 }
  0xc1   :  { %v311_v49 = vpop.f32.mrf.mxu2  ;;  %v374_v51 = vmax.f32 %v271_v48, 0.0 }
  0xc2   :  { %v352_v50 = vpop.f32.mrf.mxu3 }
  0xc3   :  { %v353_v52 = vadd.f32 %v352_v50, %v311_v49  ;;  %408 = vmatmul.f32.gmra.mxu0 %v374_v51  ;;  %490 = vmatmul.f32.gmra.mxu2 %v374_v51 }
  0xc5   :  { %v375_v53 = vmax.f32 %v353_v52, 0.0  ;;  %v232_v54 = vpop.f32.mrf.mxu0 }
  0xc6   :  { %v273_v55 = vpop.f32.mrf.mxu1 }
  0xc7   :  { %449 = vmatmul.f32.gmra.mxu1 %v375_v53  ;;  %531 = vmatmul.f32.gmra.mxu3 %v375_v53  ;;  %v274_v58 = vadd.f32 %v273_v55, %v232_v54 }
  0xc9   :  { %v314_v59 = vpop.f32.mrf.mxu2  ;;  %v376_v63 = vmax.f32 %v274_v58, 0.0 }
  0xca   :  { %v355_v62 = vpop.f32.mrf.mxu3 }
  0xcb   :  { %v356_v0 = vadd.f32 %v355_v62, %v314_v59  ;;  %411 = vmatmul.f32.gmra.mxu0 %v376_v63  ;;  %493 = vmatmul.f32.gmra.mxu2 %v376_v63 }
  0xcd   :  { %v377_v1 = vmax.f32 %v356_v0, 0.0  ;;  %v235_v10 = vpop.f32.mrf.mxu0 }
  0xce   :  { %v276_v11 = vpop.f32.mrf.mxu1 }
  0xcf   :  { %452 = vmatmul.f32.gmra.mxu1 %v377_v1  ;;  %534 = vmatmul.f32.gmra.mxu3 %v377_v1  ;;  %v277_v12 = vadd.f32 %v276_v11, %v235_v10 }
  0xd1   :  { %v317_v13 = vpop.f32.mrf.mxu2  ;;  %v378_v15 = vmax.f32 %v277_v12, 0.0 }
  0xd2   :  { %v358_v14 = vpop.f32.mrf.mxu3 }
  0xd3   :  { %v359_v16 = vadd.f32 %v358_v14, %v317_v13  ;;  %414 = vmatmul.f32.gmra.mxu0 %v378_v15  ;;  %496 = vmatmul.f32.gmra.mxu2 %v378_v15 }
  0xd5   :  { %v379_v17 = vmax.f32 %v359_v16, 0.0  ;;  %v238_v18 = vpop.f32.mrf.mxu0 }
  0xd6   :  { %v279_v19 = vpop.f32.mrf.mxu1 }
  0xd7   :  { %455 = vmatmul.f32.gmra.mxu1 %v379_v17  ;;  %537 = vmatmul.f32.gmra.mxu3 %v379_v17  ;;  %v280_v20 = vadd.f32 %v279_v19, %v238_v18 }
  0xd9   :  { %v320_v21 = vpop.f32.mrf.mxu2  ;;  %v380_v23 = vmax.f32 %v280_v20, 0.0 }
  0xda   :  { %v361_v22 = vpop.f32.mrf.mxu3 }
  0xdb   :  { %v362_v24 = vadd.f32 %v361_v22, %v320_v21  ;;  %417 = vmatmul.f32.gmra.mxu0 %v380_v23  ;;  %499 = vmatmul.f32.gmra.mxu2 %v380_v23 }
  0xdd   :  { %v381_v25 = vmax.f32 %v362_v24, 0.0  ;;  %v241_v26 = vpop.f32.mrf.mxu0 }
  0xde   :  { %v282_v27 = vpop.f32.mrf.mxu1 }
  0xdf   :  { %458 = vmatmul.f32.gmra.mxu1 %v381_v25  ;;  %540 = vmatmul.f32.gmra.mxu3 %v381_v25  ;;  %v283_v30 = vadd.f32 %v282_v27, %v241_v26 }
  0xe1   :  { %v323_v31 = vpop.f32.mrf.mxu2  ;;  %v382_v33 = vmax.f32 %v283_v30, 0.0 }
  0xe2   :  { %v364_v32 = vpop.f32.mrf.mxu3 }
  0xe3   :  { %v365_v34 = vadd.f32 %v364_v32, %v323_v31  ;;  %420 = vmatmul.f32.gmra.mxu0 %v382_v33  ;;  %502 = vmatmul.f32.gmra.mxu2 %v382_v33 }
  0xe5   :  { %v383_v35 = vmax.f32 %v365_v34, 0.0  ;;  %v244_v36 = vpop.f32.mrf.mxu0 }
  0xe6   :  { %v285_v37 = vpop.f32.mrf.mxu1 }
  0xe7   :  { %461 = vmatmul.f32.gmra.mxu1 %v383_v35  ;;  %543 = vmatmul.f32.gmra.mxu3 %v383_v35  ;;  %v286_v38 = vadd.f32 %v285_v37, %v244_v36 }
  0xe9   :  { %v326_v39 = vpop.f32.mrf.mxu2  ;;  %v384_v41 = vmax.f32 %v286_v38, 0.0 }
  0xea   :  { %v367_v40 = vpop.f32.mrf.mxu3 }
  0xeb   :  { %v368_v44 = vadd.f32 %v367_v40, %v326_v39  ;;  %423 = vmatmul.f32.gmra.mxu0 %v384_v41  ;;  %505 = vmatmul.f32.gmra.mxu2 %v384_v41 }
  0xed   :  { %v385_v45 = vmax.f32 %v368_v44, 0.0 }
  0xef   :  { %464 = vmatmul.f32.gmra.mxu1 %v385_v45  ;;  %546 = vmatmul.f32.gmra.mxu3 %v385_v45 }
 0x130   :  { %v403_v46 = vpop.f32.mrf.mxu0 }
 0x134   :  { %v444_v47 = vpop.f32.mrf.mxu1 }
 0x135   :  { %v445_v48 = vadd.f32 %v444_v47, %v403_v46 }
 0x136   :  { %v485_v50 = vpop.f32.mrf.mxu2 }
 0x137   :  { %v550_v49 = vmax.f32 %v445_v48, 0.0 }
 0x138   :  { %v406_v53 = vpop.f32.mrf.mxu0 }
 0x139   :  { %v566_v51 = vadd.f32 %v550_v49, %v770_v60 }
 0x13a   :  { %v526_v52 = vpop.f32.mrf.mxu3 }
 0x13b   :  { %582 = vst [vmem:[#allocation8] sm:$0xff] %v566_v51  ;;  %v527_v54 = vadd.f32 %v526_v52, %v485_v50 }
 0x13c   :  { %v447_v55 = vpop.f32.mrf.mxu1 }
 0x13d   :  { %v551_v58 = vmax.f32 %v527_v54, 0.0  ;;  %v448_v59 = vadd.f32 %v447_v55, %v406_v53 }
 0x13e   :  { %v488_v0 = vpop.f32.mrf.mxu2 }
 0x13f   :  { %v567_v62 = vadd.f32 %v551_v58, %v772_v61  ;;  %v552_v63 = vmax.f32 %v448_v59, 0.0 }
 0x140   :  { %v409_v11 = vpop.f32.mrf.mxu0 }
 0x141   :  { %583 = vst [vmem:[#allocation8 + $0x8] sm:$0xff] %v567_v62  ;;  %v568_v1 = vadd.f32 %v552_v63, %v778_v2 }
 0x142   :  { %v529_v10 = vpop.f32.mrf.mxu3 }
 0x143   :  { %584 = vst [vmem:[#allocation8 + $0x10] sm:$0xff] %v568_v1  ;;  %v530_v12 = vadd.f32 %v529_v10, %v488_v0 }
 0x144   :  { %v450_v13 = vpop.f32.mrf.mxu1 }
 0x145   :  { %v553_v60 = vmax.f32 %v530_v12, 0.0  ;;  %v451_v14 = vadd.f32 %v450_v13, %v409_v11 }
 0x146   :  { %v491_v17 = vpop.f32.mrf.mxu2 }
 0x147   :  { %v569_v15 = vadd.f32 %v553_v60, %v780_v3  ;;  %v554_v16 = vmax.f32 %v451_v14, 0.0 }
 0x148   :  { %v412_v19 = vpop.f32.mrf.mxu0 }
 0x149   :  { %585 = vst [vmem:[#allocation8 + $0x18] sm:$0xff] %v569_v15  ;;  %v570_v18 = vadd.f32 %v554_v16, %v786_v4 }
 0x14a   :  { %v532_v61 = vpop.f32.mrf.mxu3 }
 0x14b   :  { %586 = vst [vmem:[#allocation8 + $0x20] sm:$0xff] %v570_v18  ;;  %v533_v20 = vadd.f32 %v532_v61, %v491_v17 }
 0x14c   :  { %v453_v21 = vpop.f32.mrf.mxu1 }
 0x14d   :  { %v555_v2 = vmax.f32 %v533_v20, 0.0  ;;  %v454_v22 = vadd.f32 %v453_v21, %v412_v19 }
 0x14e   :  { %v494_v25 = vpop.f32.mrf.mxu2 }
 0x14f   :  { %v571_v23 = vadd.f32 %v555_v2, %v788_v5  ;;  %v556_v24 = vmax.f32 %v454_v22, 0.0 }
 0x150   :  { %v415_v27 = vpop.f32.mrf.mxu0 }
 0x151   :  { %587 = vst [vmem:[#allocation8 + $0x28] sm:$0xff] %v571_v23  ;;  %v572_v26 = vadd.f32 %v556_v24, %v794_v6 }
 0x152   :  { %v535_v3 = vpop.f32.mrf.mxu3 }
 0x153   :  { %588 = vst [vmem:[#allocation8 + $0x30] sm:$0xff] %v572_v26  ;;  %v536_v30 = vadd.f32 %v535_v3, %v494_v25 }
 0x154   :  { %v456_v31 = vpop.f32.mrf.mxu1 }
 0x155   :  { %v557_v4 = vmax.f32 %v536_v30, 0.0  ;;  %v457_v32 = vadd.f32 %v456_v31, %v415_v27 }
 0x156   :  { %v497_v35 = vpop.f32.mrf.mxu2 }
 0x157   :  { %v573_v33 = vadd.f32 %v557_v4, %v796_v7  ;;  %v558_v34 = vmax.f32 %v457_v32, 0.0 }
 0x158   :  { %v418_v37 = vpop.f32.mrf.mxu0 }
 0x159   :  { %589 = vst [vmem:[#allocation8 + $0x38] sm:$0xff] %v573_v33  ;;  %v574_v36 = vadd.f32 %v558_v34, %v800_v8 }
 0x15a   :  { %v538_v5 = vpop.f32.mrf.mxu3 }
 0x15b   :  { %590 = vst [vmem:[#allocation8 + $0x40] sm:$0xff] %v574_v36  ;;  %v539_v38 = vadd.f32 %v538_v5, %v497_v35 }
 0x15c   :  { %v459_v39 = vpop.f32.mrf.mxu1 }
 0x15d   :  { %v559_v6 = vmax.f32 %v539_v38, 0.0  ;;  %v460_v40 = vadd.f32 %v459_v39, %v418_v37 }
 0x15e   :  { %v500_v45 = vpop.f32.mrf.mxu2 }
 0x15f   :  { %v575_v41 = vadd.f32 %v559_v6, %v802_v9  ;;  %v560_v44 = vmax.f32 %v460_v40, 0.0 }
 0x160   :  { %v421_v47 = vpop.f32.mrf.mxu0 }
 0x161   :  { %591 = vst [vmem:[#allocation8 + $0x48] sm:$0xff] %v575_v41  ;;  %v576_v46 = vadd.f32 %v560_v44, %v810_v28 }
 0x162   :  { %v541_v7 = vpop.f32.mrf.mxu3 }
 0x163   :  { %592 = vst [vmem:[#allocation8 + $0x50] sm:$0xff] %v576_v46  ;;  %v542_v48 = vadd.f32 %v541_v7, %v500_v45 }
 0x164   :  { %v462_v49 = vpop.f32.mrf.mxu1 }
 0x165   :  { %v561_v8 = vmax.f32 %v542_v48, 0.0  ;;  %v463_v50 = vadd.f32 %v462_v49, %v421_v47 }
 0x166   :  { %v503_v53 = vpop.f32.mrf.mxu2 }
 0x167   :  { %v577_v51 = vadd.f32 %v561_v8, %v812_v29  ;;  %v562_v52 = vmax.f32 %v463_v50, 0.0 }
 0x168   :  { %v424_v55 = vpop.f32.mrf.mxu0 }
 0x169   :  { %593 = vst [vmem:[#allocation8 + $0x58] sm:$0xff] %v577_v51  ;;  %v578_v54 = vadd.f32 %v562_v52, %v818_v42 }
 0x16a   :  { %v544_v9 = vpop.f32.mrf.mxu3 }
 0x16b   :  { %594 = vst [vmem:[#allocation8 + $0x60] sm:$0xff] %v578_v54  ;;  %v545_v58 = vadd.f32 %v544_v9, %v503_v53 }
 0x16c   :  { %v465_v59 = vpop.f32.mrf.mxu1 }
 0x16d   :  { %v563_v28 = vmax.f32 %v545_v58, 0.0  ;;  %v466_v62 = vadd.f32 %v465_v59, %v424_v55 }
 0x16e   :  { %v506_v1 = vpop.f32.mrf.mxu2 }
 0x16f   :  { %v579_v63 = vadd.f32 %v563_v28, %v820_v43  ;;  %v564_v0 = vmax.f32 %v466_v62, 0.0 }
 0x171   :  { %595 = vst [vmem:[#allocation8 + $0x68] sm:$0xff] %v579_v63  ;;  %v580_v10 = vadd.f32 %v564_v0, %v826_v56 }
 0x172   :  { %v547_v29 = vpop.f32.mrf.mxu3 }
 0x173   :  { %596 = vst [vmem:[#allocation8 + $0x70] sm:$0xff] %v580_v10  ;;  %v548_v11 = vadd.f32 %v547_v29, %v506_v1 }
 0x175   :  { %v565_v42 = vmax.f32 %v548_v11, 0.0 }
 0x177   :  { %v581_v12 = vadd.f32 %v565_v42, %v828_v57 }
 0x179   :  { %597 = vst [vmem:[#allocation8 + $0x78] sm:$0xff] %v581_v12 }
 0x17a   :  { %610 = dma.vmem_to_hbm [thread:$0]  %s603_s27, 2048, %s605_s30, [#allocation4], %s727_s20, %s727_s20, %s728_s21  }
 0x17b   :  { %724 = dma.done.wait [#allocation4], 2048  }
 0x17c   :  { %725 = vsyncadd [#allocation4], 4294965248 }
 0x17d   :  { %615 = vsyncpa [#allocation3], 1 }
 0x17e   :  { %616 = vsyncpa [#allocation6], 1 }
 0x17f   :  { %617 = vsyncpa [#allocation4], 1 }

</bundles_post_ra>
